<compile_context>
chip_gen: v7x
topology: tpu7x:2x2x1
jax: 0.10.0
libtpu: 0.0.40
codegen_flags: <defaults>
</compile_context>

<pallas_src>
import functools
import math

import jax
import jax.numpy as jnp
from jax.experimental import pallas as pl
from jax.experimental.pallas import tpu as pltpu

RATIO = 0.5  # _Graph.get_global_var('ratio')


# ---------------------------------------------------------------------------
# Fused kernel: 3x3 conv (as one K=9*Cin matmul over a pre-built im2col buffer)
# + training-mode BatchNorm + per-(sample, channel) gating.
# Grid axis 0 tiles the output channels; every step is independent ("parallel").
# Layout: output channels on sublanes, flattened (N*H*W) on lanes; the output is
# stored per-sample into an (N, TC, HW) block so the wrapper reshape is free.
# ---------------------------------------------------------------------------
def _conv_bn_gate_kernel(xcol_ref, w_ref, b_ref, gamma_ref, beta_ref, gate_ref,
                         o_ref, *, n, hw):
    nhw = n * hw

    # One bf16 MXU matmul, f32 accumulation: (TC, 9*Cin) @ (9*Cin, N*H*W).
    # Border masks are already baked into the im2col buffer via zero padding.
    # NOTE: at much larger TC / NHW this accumulator should move to an explicit
    # VMEM scratch (or NHW should get its own tiled grid axis) to avoid spills.
    acc = jnp.dot(w_ref[...], xcol_ref[...], preferred_element_type=jnp.float32)
    acc = acc + b_ref[...]                                   # (TC, 1) bias -> lanes

    # BatchNorm2d (training mode): biased batch stats over (N, H, W) == lane axis.
    # Two-pass (mean, then centered variance) for numerical robustness.
    inv_cnt = 1.0 / float(nhw)
    mean = jnp.sum(acc, axis=1, keepdims=True) * inv_cnt
    centered = acc - mean
    var = jnp.sum(centered * centered, axis=1, keepdims=True) * inv_cnt
    y = centered * (jax.lax.rsqrt(var + 1e-5) * gamma_ref[...]) + beta_ref[...]

    # Gate + store in NCHW-ready layout: o_ref is (N, TC, HW); each per-sample
    # slice is a lane-dense (TC, HW) store (HW is a multiple of 128 here).
    for ni in range(n):
        o_ref[ni] = (y[:, ni * hw:(ni + 1) * hw]
                     * gate_ref[:, ni:ni + 1]).astype(o_ref.dtype)


# ---------------------------------------------------------------------------
# Wrapper: gate path in plain JAX glue + pallas_call plumbing for conv/BN/gate.
# ---------------------------------------------------------------------------
def gated_conv_bn(x, params, ratio=RATIO, tile_cout=None, out_dtype=jnp.float32):
    N, Cin, H, W = x.shape
    Cout = params["conv_w"].shape[0]
    HW, NHW = H * W, N * H * W

    # ----- gate path (tiny; kept in XLA glue per perf review) -----
    # avg_pool2d(|x|, H).view(N, Cin) == per-channel mean of |x| for square inputs.
    ss = jnp.mean(jnp.abs(x.astype(jnp.float32)), axis=(2, 3))          # (N, Cin)
    o_gate = 1.5 * jax.nn.sigmoid(ss @ params["gate_w"].T + params["gate_b"])
    rloss = jnp.sum(jnp.abs(o_gate))
    # TODO(synk): torch.topk tie-breaking / scatter_ channel masking has no Pallas
    # equivalent; it stays in XLA glue (jax.lax.top_k may break ties differently).
    inactive = int(Cout - round(Cout * ratio))
    index = jnp.ones((N, Cout), jnp.float32)
    if inactive > 0:
        _, idx = jax.lax.top_k(-o_gate, inactive)
        index = index.at[jnp.arange(N)[:, None], idx].set(0.0)
    gate_t = jnp.transpose(o_gate * index).astype(jnp.float32)          # (Cout, N)

    # ----- Cout tiling: big tiles by default so the MXU actually fills -----
    TC = min(Cout, 128) if tile_cout is None else tile_cout
    if Cout % TC != 0:
        TC = Cout
    grid = (Cout // TC,)

    # ----- masked, shifted im2col built once in the wrapper (borders -> zeros) ----
    xb = x.astype(jnp.bfloat16)
    xp = jnp.pad(xb, ((0, 0), (0, 0), (1, 1), (1, 1)))                  # spatial pad 1
    cols = jnp.stack([xp[:, :, kh:kh + H, kw:kw + W]
                      for kh in range(3) for kw in range(3)], axis=0)   # (9,N,Cin,H,W)
    xcol = jnp.transpose(cols, (0, 2, 1, 3, 4)).reshape(9 * Cin, NHW)   # (9*Cin, NHW)

    # weights flattened to match the im2col row order: col = (kh*3+kw)*Cin + ci
    w_flat = jnp.transpose(params["conv_w"], (0, 2, 3, 1)) \
                .reshape(Cout, 9 * Cin).astype(jnp.bfloat16)
    b = params["conv_b"].reshape(Cout, 1).astype(jnp.float32)
    gamma = params["bn_gamma"].reshape(Cout, 1).astype(jnp.float32)
    beta = params["bn_beta"].reshape(Cout, 1).astype(jnp.float32)

    kernel = functools.partial(_conv_bn_gate_kernel, n=N, hw=HW)

    # NOTE: xcol's index_map is constant, so Pallas DMAs it once and keeps it
    # resident across the Cout-tile grid (pl.Buffered(1) could additionally drop
    # its second buffer at larger scale). For real ResNet shapes an NHW grid axis
    # and explicit VMEM budgeting would be added (v7x: 64 MiB VMEM is binding).
    out = pl.pallas_call(
        kernel,
        grid=grid,
        in_specs=[
            pl.BlockSpec((9 * Cin, NHW), lambda i: (0, 0)),   # im2col, grid-invariant
            pl.BlockSpec((TC, 9 * Cin), lambda i: (i, 0)),    # flattened conv weights
            pl.BlockSpec((TC, 1), lambda i: (i, 0)),          # conv bias
            pl.BlockSpec((TC, 1), lambda i: (i, 0)),          # bn gamma
            pl.BlockSpec((TC, 1), lambda i: (i, 0)),          # bn beta
            pl.BlockSpec((TC, N), lambda i: (i, 0)),          # gate * index, transposed
        ],
        out_specs=pl.BlockSpec((N, TC, HW), lambda i: (0, i, 0)),  # NCHW-ready block
        out_shape=jax.ShapeDtypeStruct((N, Cout, HW), out_dtype),
        compiler_params=pltpu.CompilerParams(
            dimension_semantics=("parallel",),                # megacore split on v7x
            vmem_limit_bytes=48 * 1024 * 1024),               # explicit, < v7x physical
    )(xcol, w_flat, b, gamma, beta, gate_t)

    y = out.reshape(N, Cout, H, W)                            # free reshape, no transpose
    return y, rloss


def init_params(key, in_channels, out_channels):
    k_cw, k_cb, k_gw = jax.random.split(key, 3)
    fan_in = in_channels * 3 * 3
    bound = 1.0 / math.sqrt(fan_in)
    return {
        # nn.Conv2d default init (kaiming-uniform style bounds), deterministic
        "conv_w": jax.random.uniform(k_cw, (out_channels, in_channels, 3, 3),
                                     jnp.float32, -bound, bound),
        "conv_b": jax.random.uniform(k_cb, (out_channels,), jnp.float32, -bound, bound),
        # gate.weight ~ N(0, sqrt(2/out_channels)); gate.bias = 1
        "gate_w": jax.random.normal(k_gw, (out_channels, in_channels), jnp.float32)
                  * math.sqrt(2.0 / out_channels),
        "gate_b": jnp.ones((out_channels,), jnp.float32),
        # BatchNorm2d affine defaults
        "bn_gamma": jnp.ones((out_channels,), jnp.float32),
        "bn_beta": jnp.zeros((out_channels,), jnp.float32),
    }


def _reference(x, params, ratio):
    """Pure-JAX reference (conv on the same bf16-rounded operands, f32 math)."""
    N, Cin, H, W = x.shape
    Cout = params["conv_w"].shape[0]
    xb = x.astype(jnp.bfloat16).astype(jnp.float32)
    wb = params["conv_w"].astype(jnp.bfloat16).astype(jnp.float32)
    conv = jax.lax.conv_general_dilated(
        xb, wb, window_strides=(1, 1), padding=((1, 1), (1, 1)),
        dimension_numbers=("NCHW", "OIHW", "NCHW"))
    conv = conv + params["conv_b"][None, :, None, None]
    mean = jnp.mean(conv, axis=(0, 2, 3), keepdims=True)
    var = jnp.mean((conv - mean) ** 2, axis=(0, 2, 3), keepdims=True)
    y = (conv - mean) * jax.lax.rsqrt(var + 1e-5)
    y = y * params["bn_gamma"][None, :, None, None] + params["bn_beta"][None, :, None, None]
    ss = jnp.mean(jnp.abs(x.astype(jnp.float32)), axis=(2, 3))
    o_gate = 1.5 * jax.nn.sigmoid(ss @ params["gate_w"].T + params["gate_b"])
    rloss = jnp.sum(jnp.abs(o_gate))
    inactive = int(Cout - round(Cout * ratio))
    index = jnp.ones((N, Cout), jnp.float32)
    if inactive > 0:
        _, idx = jax.lax.top_k(-o_gate, inactive)
        index = index.at[jnp.arange(N)[:, None], idx].set(0.0)
    return y * (o_gate * index)[:, :, None, None], rloss


if __name__ == "__main__":
    key = jax.random.PRNGKey(0)
    k_param, k_x = jax.random.split(key)

    # small shapes consistent with the module
    N, Cin, Cout, H, W = 2, 4, 16, 16, 16
    params = init_params(k_param, Cin, Cout)
    x = jax.random.normal(k_x, (N, Cin, H, W), jnp.float32)

    # default tiling: TC = Cout (single grid step; MXU gets the full LHS)
    y1, rloss1 = gated_conv_bn(x, params, ratio=RATIO)
    # split tiling: exercises a real 2-step "parallel" Cout grid (v7x 2-TC split)
    y2, rloss2 = gated_conv_bn(x, params, ratio=RATIO, tile_cout=Cout // 2)
    jax.block_until_ready((y1, rloss1, y2, rloss2))

    assert y1.shape == (N, Cout, H, W)
    assert rloss1.shape == ()
    assert bool(jnp.allclose(y1, y2, atol=1e-4, rtol=1e-4))

    y_ref, rloss_ref = _reference(x, params, RATIO)
    assert bool(jnp.allclose(y1, y_ref, atol=5e-3, rtol=5e-3))
    assert bool(jnp.allclose(rloss1, rloss_ref, atol=1e-4, rtol=1e-4))

    print("KERNEL_OK")
</pallas_src>

<mosaic_0001>
module attributes {stable_mosaic.version = 11 : i64} {
  func.func @_conv_bn_gate_kernel(%arg0: i32, %arg1: memref<36x512xbf16, #tpu.memory_space<vmem>>, %arg2: memref<16x36xbf16, #tpu.memory_space<vmem>>, %arg3: memref<16x1xf32, #tpu.memory_space<vmem>>, %arg4: memref<16x1xf32, #tpu.memory_space<vmem>>, %arg5: memref<16x1xf32, #tpu.memory_space<vmem>>, %arg6: memref<16x2xf32, #tpu.memory_space<vmem>>, %arg7: memref<2x16x256xf32, #tpu.memory_space<vmem>>) attributes {dimension_semantics = [#tpu.dimension_semantics<parallel>], iteration_bounds = array<i64: 1>, scalar_prefetch = 0 : i64, scratch_operands = 0 : i64, tpu.core_type = #tpu.core_type<tc>, window_params = [{pipeline_mode = #tpu.pipeline_mode<synchronous>, transform_indices = @transform_0, window_bounds = array<i64: 36, 512>}, {transform_indices = @transform_1, window_bounds = array<i64: 16, 36>}, {transform_indices = @transform_2, window_bounds = array<i64: 16, 1>}, {transform_indices = @transform_3, window_bounds = array<i64: 16, 1>}, {transform_indices = @transform_4, window_bounds = array<i64: 16, 1>}, {transform_indices = @transform_5, window_bounds = array<i64: 16, 2>}, {transform_indices = @transform_6, window_bounds = array<i64: 2, 16, 256>}]} {
    %c0 = arith.constant 0 : index
    %c0_0 = arith.constant 0 : index
    %0 = vector.load %arg2[%c0, %c0_0] : memref<16x36xbf16, #tpu.memory_space<vmem>>, vector<16x36xbf16>
    %c0_1 = arith.constant 0 : index
    %c0_2 = arith.constant 0 : index
    %1 = vector.load %arg1[%c0_1, %c0_2] : memref<36x512xbf16, #tpu.memory_space<vmem>>, vector<36x512xbf16>
    %cst = arith.constant dense<0.000000e+00> : vector<16x512xf32>
    %2 = tpu.matmul %0, %1, %cst {dimension_numbers = #tpu.dot_dimension_numbers<[1], [0], [0], [1], [0, 0, 1, 1], [], []>} : vector<16x36xbf16>, vector<36x512xbf16>, vector<16x512xf32> -> vector<16x512xf32>
    %c0_3 = arith.constant 0 : index
    %c0_4 = arith.constant 0 : index
    %3 = vector.load %arg3[%c0_3, %c0_4] : memref<16x1xf32, #tpu.memory_space<vmem>>, vector<16x1xf32>
    %4 = vector.broadcast %3 : vector<16x1xf32> to vector<16x512xf32>
    %5 = arith.addf %2, %4 : vector<16x512xf32>
    %cst_5 = arith.constant dense<0.000000e+00> : vector<16xf32>
    %6 = vector.multi_reduction <add>, %5, %cst_5 [1] : vector<16x512xf32> to vector<16xf32>
    %7 = vector.shape_cast %6 : vector<16xf32> to vector<16x1xf32>
    %cst_6 = arith.constant 0.001953125 : f32
    %8 = vector.broadcast %cst_6 : f32 to vector<16x1xf32>
    %9 = arith.mulf %7, %8 : vector<16x1xf32>
    %10 = vector.broadcast %9 : vector<16x1xf32> to vector<16x512xf32>
    %11 = arith.subf %5, %10 : vector<16x512xf32>
    %12 = arith.mulf %11, %11 : vector<16x512xf32>
    %cst_7 = arith.constant dense<0.000000e+00> : vector<16xf32>
    %13 = vector.multi_reduction <add>, %12, %cst_7 [1] : vector<16x512xf32> to vector<16xf32>
    %14 = vector.shape_cast %13 : vector<16xf32> to vector<16x1xf32>
    %cst_8 = arith.constant 0.001953125 : f32
    %15 = vector.broadcast %cst_8 : f32 to vector<16x1xf32>
    %16 = arith.mulf %14, %15 : vector<16x1xf32>
    %cst_9 = arith.constant 9.99999974E-6 : f32
    %17 = vector.broadcast %cst_9 : f32 to vector<16x1xf32>
    %18 = arith.addf %16, %17 : vector<16x1xf32>
    %19 = math.rsqrt %18 : vector<16x1xf32>
    %c0_10 = arith.constant 0 : index
    %c0_11 = arith.constant 0 : index
    %20 = vector.load %arg4[%c0_10, %c0_11] : memref<16x1xf32, #tpu.memory_space<vmem>>, vector<16x1xf32>
    %21 = arith.mulf %19, %20 : vector<16x1xf32>
    %22 = vector.broadcast %21 : vector<16x1xf32> to vector<16x512xf32>
    %23 = arith.mulf %11, %22 : vector<16x512xf32>
    %c0_12 = arith.constant 0 : index
    %c0_13 = arith.constant 0 : index
    %24 = vector.load %arg5[%c0_12, %c0_13] : memref<16x1xf32, #tpu.memory_space<vmem>>, vector<16x1xf32>
    %25 = vector.broadcast %24 : vector<16x1xf32> to vector<16x512xf32>
    %26 = arith.addf %23, %25 : vector<16x512xf32>
    %27 = vector.extract_strided_slice %26 {offsets = [0, 0], sizes = [16, 256], strides = [1, 1]} : vector<16x512xf32> to vector<16x256xf32>
    %c0_14 = arith.constant 0 : index
    %c0_15 = arith.constant 0 : index
    %28 = vector.load %arg6[%c0_14, %c0_15] : memref<16x2xf32, #tpu.memory_space<vmem>>, vector<16x1xf32>
    %29 = vector.broadcast %28 : vector<16x1xf32> to vector<16x256xf32>
    %30 = arith.mulf %27, %29 : vector<16x256xf32>
    %c0_16 = arith.constant 0 : index
    %c0_17 = arith.constant 0 : index
    %c0_18 = arith.constant 0 : index
    %31 = vector.load %arg7[%c0_16, %c0_17, %c0_18] : memref<2x16x256xf32, #tpu.memory_space<vmem>>, vector<1x16x256xf32>
    %32 = vector.shape_cast %31 : vector<1x16x256xf32> to vector<16x256xf32>
    %33 = vector.shape_cast %30 : vector<16x256xf32> to vector<1x16x256xf32>
    tpu.vector_store %arg7[%c0_16, %c0_17, %c0_18], %33 {strides = array<i32>} : memref<2x16x256xf32, #tpu.memory_space<vmem>>, vector<1x16x256xf32>,
    %34 = vector.extract_strided_slice %26 {offsets = [0, 256], sizes = [16, 256], strides = [1, 1]} : vector<16x512xf32> to vector<16x256xf32>
    %c0_19 = arith.constant 0 : index
    %c1 = arith.constant 1 : index
    %35 = vector.load %arg6[%c0_19, %c1] : memref<16x2xf32, #tpu.memory_space<vmem>>, vector<16x1xf32>
    %36 = vector.broadcast %35 : vector<16x1xf32> to vector<16x256xf32>
    %37 = arith.mulf %34, %36 : vector<16x256xf32>
    %c1_20 = arith.constant 1 : index
    %c0_21 = arith.constant 0 : index
    %c0_22 = arith.constant 0 : index
    %38 = vector.load %arg7[%c1_20, %c0_21, %c0_22] : memref<2x16x256xf32, #tpu.memory_space<vmem>>, vector<1x16x256xf32>
    %39 = vector.shape_cast %38 : vector<1x16x256xf32> to vector<16x256xf32>
    %40 = vector.shape_cast %37 : vector<16x256xf32> to vector<1x16x256xf32>
    tpu.vector_store %arg7[%c1_20, %c0_21, %c0_22], %40 {strides = array<i32>} : memref<2x16x256xf32, #tpu.memory_space<vmem>>, vector<1x16x256xf32>,
    return
  }
  func.func @transform_0(%arg0: i32) -> (i32, i32) {
    %c0_i32 = arith.constant 0 : i32
    %c0_i32_0 = arith.constant 0 : i32
    %c0_i32_1 = arith.constant 0 : i32
    return %c0_i32, %c0_i32_0 : i32, i32
  }
  func.func @transform_1(%arg0: i32) -> (i32, i32) {
    %c0_i32 = arith.constant 0 : i32
    %c0_i32_0 = arith.constant 0 : i32
    return %arg0, %c0_i32 : i32, i32
  }
  func.func @transform_2(%arg0: i32) -> (i32, i32) {
    %c0_i32 = arith.constant 0 : i32
    %c0_i32_0 = arith.constant 0 : i32
    return %arg0, %c0_i32 : i32, i32
  }
  func.func @transform_3(%arg0: i32) -> (i32, i32) {
    %c0_i32 = arith.constant 0 : i32
    %c0_i32_0 = arith.constant 0 : i32
    return %arg0, %c0_i32 : i32, i32
  }
  func.func @transform_4(%arg0: i32) -> (i32, i32) {
    %c0_i32 = arith.constant 0 : i32
    %c0_i32_0 = arith.constant 0 : i32
    return %arg0, %c0_i32 : i32, i32
  }
  func.func @transform_5(%arg0: i32) -> (i32, i32) {
    %c0_i32 = arith.constant 0 : i32
    %c0_i32_0 = arith.constant 0 : i32
    return %arg0, %c0_i32 : i32, i32
  }
  func.func @transform_6(%arg0: i32) -> (i32, i32, i32) {
    %c0_i32 = arith.constant 0 : i32
    %c0_i32_0 = arith.constant 0 : i32
    %c0_i32_1 = arith.constant 0 : i32
    return %c0_i32, %arg0, %c0_i32_0 : i32, i32, i32
  }
}

</mosaic_0001>

<bundles_post_ra>
// kernel: tpu_custom_call.1
= control target key start
LH: loop header
LB: loop body
LE: loop exit
PB: predicated region body
PF: predicated region fallthrough
CT: control target
= control target key end

     0   :  { %11 = vsyncpa [#allocation3], 0  ;;  %s590_s0 = inlined_call_operand.hbm [shape: bf16[36,512], index: 0, kind: input, shape index: {}]   ;;  %s591_s1 = inlined_call_operand.vmem [shape: bf16[16,36], index: 1, kind: input, shape index: {}]   ;;  %s592_s2 = inlined_call_operand.vmem [shape: f32[16,1], index: 2, kind: input, shape index: {}]   ;;  %s593_s3 = inlined_call_operand.vmem [shape: f32[16,1], index: 3, kind: input, shape index: {}]   ;;  %s594_s4 = inlined_call_operand.vmem [shape: f32[16,1], index: 4, kind: input, shape index: {}]   ;;  %s595_s5 = inlined_call_operand.vmem [shape: f32[16,2], index: 5, kind: input, shape index: {}]   ;;  %s596_s6 = inlined_call_operand.hbm [shape: f32[2,16,256], index: 6, kind: output, shape index: {}]  }
   0x1   :  { %12 = vsyncpa [#allocation4], 0  ;;  %s463_s21 = smov [#allocation2]   ;;  %s415_s25 = scalar_lea.hbm %s590_s0, 1280 }
   0x2   :  { %s18_s22 = sshll.u32 %s463_s21, 4  ;;  %p416_p0 = scmp.ne.s32.totalorder %s590_s0, %s415_s25  ;;  %s19_s22 = int_to_ptr.vmem [resolvable:$true] %s18_s22 }
   0x3   :  { %p419_p1 = scmp.lt.u32.totalorder %s415_s25, %s590_s0 }
   0x5   :  { %p421_p2 = pnand %p419_p1, %p416_p0 }
   0x7   :  { %424 = shalt.err (!%p421_p2)
}
   0x8   :  { %s425_s30 = scalar_lea.vmem %s19_s22, 1280  ;;  %p430_p4 = scmp.lt.s32.totalorder %s19_s22, %s19_s22 }
   0x9   :  { %p426_p3 = scmp.ne.s32.totalorder %s19_s22, %s425_s30  ;;  %p431_p5 = scmp.lt.s32.totalorder %s425_s30, %s425_s30 }
   0xb   :  { %p432_p6 = por %p431_p5, %p430_p4 }
   0xd   :  { %p433_p7 = pnand %p432_p6, %p426_p3 }
   0xf   :  { %436 = shalt.err (!%p433_p7)
}
  0x10   :  { %s464_s7 = smov 256   ;;  %s465_s8 = smov 16  }
  0x11   :  { %24 = dma.hbm_to_vmem [thread:$0]  %s590_s0, 1280, %s19_s22, [#allocation3], %s464_s7, %s464_s7, %s465_s8  }
  0x12   :  { %459 = dma.done.wait [#allocation3], 1280  }
  0x13   :  { %460 = vsyncadd [#allocation3], 4294966016  ;;  %v466_v0 = vmov 0   ;;  %v394_v1 = vld [vmem:[#allocation2 + $0x4] ss:$16 sps:$4 sm:$0xff]   ;;  %vm122_vm0 = vcmask 1041408  }
  0x14   :  { %167 = vmatprep.mubr.bf16.mxu0 %v466_v0  ;;  %210 = vmatprep.mubr.bf16.mxu1 %v466_v0  ;;  %v396_v2 = vld [vmem:[#allocation2 + $0xc] ss:$16 sps:$4 sm:$0xff]   ;;  %v398_v3 = vld [vmem:[#allocation2] ss:$16 sps:$4 sm:$0xff]   ;;  %v399_v4 = vld [vmem:[#allocation2 + $0x8] ss:$16 sps:$4 sm:$0xff]  }
  0x15   :  { %388 = vset.pattern.permute.xlu0 %v466_v0  ;;  %389 = vset.pattern.permute.xlu1 %v466_v0  ;;  %v400_v5 = vld [vmem:[#allocation2 + $0x24] ss:$16 sps:$4 sm:$0xff]   ;;  %v402_v6 = vld [vmem:[#allocation2 + $0x2c] ss:$16 sps:$4 sm:$0xff]   ;;  %v404_v7 = vld [vmem:[#allocation2 + $0x20] ss:$16 sps:$4 sm:$0xff]  }
  0x16   :  { %135 = vmatprep.subr.bf16.mxu0 %v394_v1  ;;  %178 = vmatprep.subr.bf16.mxu1 %v396_v2  ;;  %v405_v8 = vld [vmem:[#allocation2 + $0x28] ss:$16 sps:$4 sm:$0xff]   ;;  %v49_v9 = vld [vmem:[#allocation2 + $0x40] sm:$0x33]  ;;  %vm118_vm1 = vcmask 293888  }
  0x17   :  { %136 = vmatpush1.bf16.msra.mxu0 %v398_v3  ;;  %179 = vmatpush1.bf16.msra.mxu1 %v399_v4  ;;  %v50_v10 = vld [vmem:[#allocation2 + $0x48] sm:$0x33]  ;;  %v375_v11 = vcombine.high %v49_v9, %v49_v9  ;;  %v374_v13 = vcombine.low %v49_v9, %v49_v9  ;;  %v51_v15 = vld [vmem:[%s592_s2] sm:$0xff] }
  0x18   :  { %137 = vmatprep.subr.bf16.mxu0 %v400_v5  ;;  %180 = vmatprep.subr.bf16.mxu1 %v402_v6  ;;  %v377_v12 = vcombine.high %v50_v10, %v50_v10  ;;  %v376_v14 = vcombine.low %v50_v10, %v50_v10  ;;  %v410_v18 = vld [vmem:[%s591_s1] sm:$0xff]   ;;  %v52_v19 = vld [vmem:[%s592_s2 + $0x8] sm:$0xff] }
  0x19   :  { %v124_v16 = vsel %vm122_vm0, %v374_v13, 0  ;;  %55 = vperm.xlu0 %388, %v51_v15   ;;  %v288_v9 = vld [vmem:[%s594_s4 + $0x8] sm:$0xff] }
  0x1a   :  { %v130_v17 = vsel %vm122_vm0, %v376_v14, 0  ;;  %v308_v10 = vld [vmem:[%s595_s5 + $0x8] sm:$0xff] }
  0x1b   :  { %138 = vmatpush1.bf16.msra.mxu0 %v404_v7  ;;  %181 = vmatpush1.bf16.msra.mxu1 %v405_v8  ;;  %v287_v7 = vld [vmem:[%s594_s4] sm:$0xff] }
  0x1c   :  { %378 = vmatprep.subr.msk.bf16.mxu0 %vm122_vm0, %v375_v11  ;;  %380 = vmatprep.subr.msk.bf16.mxu1 %vm122_vm0, %v377_v12  ;;  %v307_v8 = vld [vmem:[%s595_s5] sm:$0xff]  ;;  %v467_v11 = vmov 1  }
  0x1d   :  { %60 = vperm.xlu0 %388, %v52_v19  }
  0x1f   :  { %140 = vmatpush1.bf16.msra.mxu0 %v124_v16  ;;  %183 = vmatpush1.bf16.msra.mxu1 %v130_v17 }
  0x22   :  { %379 = vmatmul.mubr.msk.bf16.vlgmr.msra.gmra.mrb[0].mxu0 %vm118_vm1, %v410_v18  ;;  %381 = vmatmul.mubr.msk.bf16.vlgmr.msra.gmra.mrb[0].mxu1 %vm118_vm1, %v410_v18  ;;  %v265_v18 = vld [vmem:[%s593_s3] sm:$0xff] }
  0x98   :  { %v56_v20 = vpop.permute.xlu0 %55 }
  0x9c   :  { %v61_v21 = vpop.permute.xlu0 %60 }
  0xf5   :  { %v169_v22 = vpop.f32.mrb[0].mxu0  ;;  %v212_v23 = vpop.f32.mrb[0].mxu1 }
  0xf6   :  { %v170_v24 = vadd.f32 %v169_v22, %v56_v20  ;;  %v171_v25 = vpop.f32.mrb[1].mxu0  ;;  %v214_v26 = vpop.f32.mrb[1].mxu1  ;;  %v213_v33 = vadd.f32 %v212_v23, %v56_v20 }
  0xf7   :  { %v172_v27 = vadd.f32 %v171_v25, %v56_v20  ;;  %v173_v28 = vpop.f32.mrb[2].mxu0  ;;  %v216_v29 = vpop.f32.mrb[2].mxu1  ;;  %v215_v36 = vadd.f32 %v214_v26, %v56_v20 }
  0xf8   :  { %v174_v30 = vadd.f32 %v173_v28, %v61_v21  ;;  %v175_v31 = vpop.f32.mrb[3].mxu0  ;;  %v218_v32 = vpop.f32.mrb[3].mxu1  ;;  %v217_v37 = vadd.f32 %v216_v29, %v61_v21 }
  0xf9   :  { %v221_v34 = vadd.f32 %v172_v27, %v170_v24  ;;  %v176_v35 = vadd.f32 %v175_v31, %v61_v21  ;;  %v219_v42 = vadd.f32 %v218_v32, %v61_v21  ;;  %v266_v21 = vld [vmem:[%s593_s3 + $0x8] sm:$0xff]  ;;  %s468_s3 = smov [#allocation5]  }
  0xfa   :  { %s353_s24 = sshll.u32 %s468_s3, 4  ;;  %s354_s24 = int_to_ptr.vmem [resolvable:$true] %s353_s24 }
  0xfb   :  { %v226_v38 = vadd.f32 %v176_v35, %v174_v30  ;;  %v222_v39 = vadd.f32 %v221_v34, %v213_v33  ;;  %s437_s25 = scalar_lea.vmem %s354_s24, 1024  ;;  %p442_p9 = scmp.lt.s32.totalorder %s354_s24, %s354_s24 }
  0xfc   :  { %p438_p8 = scmp.ne.s32.totalorder %s354_s24, %s437_s25  ;;  %p443_p10 = scmp.lt.s32.totalorder %s437_s25, %s437_s25 }
  0xfd   :  { %v223_v40 = vadd.f32 %v222_v39, %v215_v36  ;;  %v227_v41 = vadd.f32 %v226_v38, %v217_v37 }
  0xfe   :  { %p444_p11 = por %p443_p10, %p442_p9 }
  0xff   :  { %224 = vadd.xlane.f32.xlu1 %v223_v40  ;;  %v228_v43 = vadd.f32 %v227_v41, %v219_v42 }
 0x100   :  { %p445_p12 = pnand %p444_p11, %p438_p8 }
 0x103   :  { %229 = vadd.xlane.f32.xlu1 %v228_v43 }
 0x18c   :  { %v225_v44 = vpop.xlane.xlu1 %224 }
 0x18d   :  { %v231_v45 = vmul.f32 0.001953125, %v225_v44 }
 0x18f   :  { %v233_v46 = vsub.f32 %v170_v24, %v231_v45  ;;  %v234_v47 = vsub.f32 %v172_v27, %v231_v45  ;;  %v235_v48 = vsub.f32 %v213_v33, %v231_v45  ;;  %v236_v50 = vsub.f32 %v215_v36, %v231_v45 }
 0x190   :  { %v230_v49 = vpop.xlane.xlu1 %229 }
 0x191   :  { %v232_v51 = vmul.f32 0.001953125, %v230_v49  ;;  %v241_v52 = vmul.f32 %v233_v46, %v233_v46  ;;  %v242_v53 = vmul.f32 %v234_v47, %v234_v47  ;;  %v243_v54 = vmul.f32 %v235_v48, %v235_v48 }
 0x192   :  { %v244_v59 = vmul.f32 %v236_v50, %v236_v50 }
 0x193   :  { %v536_v55 = vsub.f32 %v174_v30, %v232_v51  ;;  %v538_v56 = vsub.f32 %v176_v35, %v232_v51  ;;  %v249_v57 = vadd.f32 %v242_v53, %v241_v52  ;;  %v540_v58 = vsub.f32 %v217_v37, %v232_v51 }
 0x194   :  { %v542_v61 = vsub.f32 %v219_v42, %v232_v51 }
 0x195   :  { %v250_v60 = vadd.f32 %v249_v57, %v243_v54  ;;  %v245_v62 = vmul.f32 %v536_v55, %v536_v55  ;;  %v246_v63 = vmul.f32 %v538_v56, %v538_v56  ;;  %v247_v2 = vmul.f32 %v540_v58, %v540_v58 }
 0x196   :  { %v248_v4 = vmul.f32 %v542_v61, %v542_v61 }
 0x197   :  { %v251_v1 = vadd.f32 %v250_v60, %v244_v59  ;;  %v254_v3 = vadd.f32 %v246_v63, %v245_v62 }
 0x199   :  { %252 = vadd.xlane.f32.xlu0 %v251_v1  ;;  %v255_v5 = vadd.f32 %v254_v3, %v247_v2 }
 0x19b   :  { %v256_v6 = vadd.f32 %v255_v5, %v248_v4 }
 0x19d   :  { %257 = vadd.xlane.f32.xlu1 %v256_v6 }
 0x1ae   :  { %291 = vperm.xlu1 %389, %v287_v7  }
 0x1af   :  { %311 = vperm.xlu0 %388, %v307_v8  }
 0x1b2   :  { %296 = vperm.xlu1 %389, %v288_v9  }
 0x1b3   :  { %393 = vset.pattern.permute.xlu0 %v467_v11 }
 0x1b6   :  { %316 = vperm.xlu1 %389, %v308_v10  }
 0x1ba   :  { %390 = vset.pattern.permute.xlu1 %v467_v11 }
 0x1bb   :  { %331 = vperm.xlu1 %390, %v307_v8  }
 0x1bf   :  { %391 = vset.pattern.permute.xlu1 %v466_v0 }
 0x226   :  { %v253_v12 = vpop.xlane.xlu0 %252 }
 0x227   :  { %v259_v13 = vmul.f32 0.001953125, %v253_v12 }
 0x229   :  { %v261_v14 = vadd.f32 1e-05, %v259_v13 }
 0x22a   :  { %v258_v15 = vpop.xlane.xlu1 %257 }
 0x22b   :  { %411 = vrsqrt.f32 %v261_v14  ;;  %v260_v16 = vmul.f32 0.001953125, %v258_v15 }
 0x22d   :  { %v262_v17 = vadd.f32 1e-05, %v260_v16 }
 0x22e   :  { %v292_v23 = vpop.permute.xlu1 %291  ;;  %v312_v36 = vpop.permute.xlu0 %311 }
 0x22f   :  { %413 = vrsqrt.f32 %v262_v17 }
 0x232   :  { %v297_v24 = vpop.permute.xlu1 %296 }
 0x235   :  { %v412_v19 = vpop.eup %411 }
 0x236   :  { %v267_v20 = vmul.f32 %v412_v19, %v265_v18  ;;  %v317_v25 = vpop.permute.xlu1 %316 }
 0x238   :  { %271 = vperm.xlu1 %391, %v267_v20  }
 0x239   :  { %v414_v0 = vpop.eup %413 }
 0x23a   :  { %v268_v22 = vmul.f32 %v414_v0, %v266_v21  ;;  %v332_v26 = vpop.permute.xlu1 %331 }
 0x23c   :  { %276 = vperm.xlu1 %391, %v268_v22  }
 0x240   :  { %392 = vset.pattern.permute.xlu1 %v467_v11 }
 0x241   :  { %336 = vperm.xlu1 %392, %v308_v10  }
 0x2b7   :  { %v272_v27 = vpop.permute.xlu1 %271 }
 0x2b8   :  { %v279_v28 = vmul.f32 %v272_v27, %v233_v46  ;;  %v280_v29 = vmul.f32 %v272_v27, %v234_v47  ;;  %v281_v30 = vmul.f32 %v272_v27, %v235_v48  ;;  %v282_v31 = vmul.f32 %v272_v27, %v236_v50 }
 0x2ba   :  { %v299_v32 = vadd.f32 %v292_v23, %v279_v28  ;;  %v300_v33 = vadd.f32 %v292_v23, %v280_v29  ;;  %v301_v34 = vadd.f32 %v292_v23, %v281_v30  ;;  %v302_v35 = vadd.f32 %v292_v23, %v282_v31 }
 0x2bb   :  { %v277_v37 = vpop.permute.xlu1 %276 }
 0x2bc   :  { %v319_v38 = vmul.f32 %v312_v36, %v299_v32  ;;  %v320_v39 = vmul.f32 %v312_v36, %v300_v33  ;;  %v339_v40 = vmul.f32 %v332_v26, %v301_v34  ;;  %v340_v41 = vmul.f32 %v332_v26, %v302_v35 }
 0x2bd   :  { %v283_v42 = vmul.f32 %v277_v37, %v536_v55  ;;  %v284_v43 = vmul.f32 %v277_v37, %v538_v56  ;;  %v285_v44 = vmul.f32 %v277_v37, %v540_v58  ;;  %v286_v45 = vmul.f32 %v277_v37, %v542_v61 }
 0x2be   :  { %323 = vst [vmem:[#allocation5] sm:$0xff] %v319_v38  ;;  %324 = vst [vmem:[#allocation5 + $0x8] sm:$0xff] %v320_v39 }
 0x2bf   :  { %344 = vst [vmem:[#allocation5 + $0x20] sm:$0xff] %v339_v40  ;;  %345 = vst [vmem:[#allocation5 + $0x28] sm:$0xff] %v340_v41  ;;  %v303_v46 = vadd.f32 %v297_v24, %v283_v42  ;;  %v304_v47 = vadd.f32 %v297_v24, %v284_v43  ;;  %v305_v48 = vadd.f32 %v297_v24, %v285_v44 }
 0x2c0   :  { %v306_v49 = vadd.f32 %v297_v24, %v286_v45  ;;  %v337_v50 = vpop.permute.xlu1 %336 }
 0x2c1   :  { %v321_v51 = vmul.f32 %v317_v25, %v303_v46  ;;  %v322_v52 = vmul.f32 %v317_v25, %v304_v47  ;;  %v341_v53 = vmul.f32 %v337_v50, %v305_v48 }
 0x2c2   :  { %v342_v54 = vmul.f32 %v337_v50, %v306_v49 }
 0x2c3   :  { %325 = vst [vmem:[#allocation5 + $0x10] sm:$0xff] %v321_v51  ;;  %326 = vst [vmem:[#allocation5 + $0x18] sm:$0xff] %v322_v52 }
 0x2c4   :  { %346 = vst [vmem:[#allocation5 + $0x30] sm:$0xff] %v341_v53  ;;  %347 = vst [vmem:[#allocation5 + $0x38] sm:$0xff] %v342_v54 }
 0x2c5   :  { %448 = shalt.err (!%p445_p12)
}
 0x2c6   :  { %s449_s28 = scalar_lea.hbm %s596_s6, 1024 }
 0x2c7   :  { %p450_p13 = scmp.ne.s32.totalorder %s596_s6, %s449_s28  ;;  %p453_p0 = scmp.lt.u32.totalorder %s449_s28, %s596_s6 }
 0x2c9   :  { %p455_p1 = pnand %p453_p0, %p450_p13 }
 0x2cb   :  { %458 = shalt.err (!%p455_p1)
}
 0x2cc   :  { %359 = dma.vmem_to_hbm [thread:$0]  %s354_s24, 1024, %s596_s6, [#allocation4], %s464_s7, %s464_s7, %s465_s8  }
 0x2cd   :  { %461 = dma.done.wait [#allocation4], 1024  }
 0x2ce   :  { %462 = vsyncadd [#allocation4], 4294966272 }
 0x2cf   :  { %363 = vsyncpa [#allocation3], 1 }
 0x2d0   :  { %364 = vsyncpa [#allocation4], 1 }

</bundles_post_ra>
